<compile_context>
chip_gen: v5e
topology: v5e:2x2
jax: 0.10.0
libtpu: 0.0.40
codegen_flags: <defaults>
</compile_context>

<pallas_src>
import functools
from types import SimpleNamespace

import jax
import jax.numpy as jnp
from jax import lax
from jax.experimental import pallas as pl
from jax.experimental.pallas import tpu as pltpu


def _net_model_kernel(u_ref, col_ref, w_ref, scal_ref, du_ref, *,
                      ny, flux_calc_idx, flux_couple_idx, state_couple_idx):
    """Single-invocation kernel.

    u_ref    : (V, N)   f32 VMEM   flattened state, N = Nx*Ny on the lane axis
    col_ref  : (1, N)   i32 VMEM   column index (k % Ny) per flattened cell
    w_ref    : (V, H, 6) f32 VMEM  packed MLP weights [fw1, fb1, fw2, sw1, sb1, sw2]
    scal_ref : (V, 3)   f32 SMEM   per-variable scalars [flux_b2, D_eff, state_b2]
    du_ref   : (V, N)   f32 VMEM   output du/dt (flattened)
    """
    num_vars, n = du_ref.shape  # n = Nx * Ny

    # --- boundary masks for the flattened 5-point stencil (built once, shared by all vars) ---
    lane = lax.broadcasted_iota(jnp.int32, (1, n), 1)
    col = col_ref[...]                      # (1, n) int32
    not_top = lane >= ny                    # row > 0
    not_bot = lane < (n - ny)               # row < Nx - 1
    not_left = col > 0
    not_right = col < ny - 1

    for v in range(num_vars):               # V is tiny and static -> fully unrolled
        u_main = u_ref[pl.ds(flux_calc_idx[v], 1), :]      # (1, n)
        u_fc = u_ref[pl.ds(flux_couple_idx[v], 1), :]      # (1, n)
        u_sc = u_ref[pl.ds(state_couple_idx[v], 1), :]     # (1, n)

        wv = w_ref[v]                                      # (H, 6), H on sublanes
        fw1, fb1, fw2 = wv[:, 0:1], wv[:, 1:2], wv[:, 2:3]
        sw1, sb1, sw2 = wv[:, 3:4], wv[:, 4:5], wv[:, 5:6]
        fb2 = scal_ref[v, 0]
        d_eff = scal_ref[v, 1]
        sb2 = scal_ref[v, 2]

        # --- learned flux multiplier: per-cell MLP 1 -> H -> 1 (tanh hidden, sigmoid out) ---
        # lane-dense (H, n) = (32, 256) intermediate; VPU broadcast-MAC (MXU not worth it).
        h = jnp.tanh(u_fc * fw1 + fb1)                          # (H, n)
        z = jnp.sum(h * fw2, axis=0, keepdims=True) + fb2       # (1, n)
        ret = pl.reciprocal(1.0 + jnp.exp(-z), approx=True)     # sigmoid (EUP recip)

        # --- finite-volume 5-point stencil, zero-flux (Neumann-0) boundaries, flat layout ---
        up = jnp.where(not_top, pltpu.roll(u_main, ny, axis=1), u_main)
        down = jnp.where(not_bot, pltpu.roll(u_main, n - ny, axis=1), u_main)
        left = jnp.where(not_left, pltpu.roll(u_main, 1, axis=1), u_main)
        right = jnp.where(not_right, pltpu.roll(u_main, n - 1, axis=1), u_main)
        lap = up + down + left + right - 4.0 * u_main
        flux = d_eff * ret * lap                                # (1, n)

        # --- learned state / reaction term: per-cell MLP 1 -> H -> 1 (tanh hidden, linear) ---
        hs = jnp.tanh(u_sc * sw1 + sb1)                         # (H, n)
        react = jnp.sum(hs * sw2, axis=0, keepdims=True) + sb2  # (1, n)

        du_ref[pl.ds(v, 1), :] = flux + react


def net_model_forward(t, u, params, cfg):
    """du/dt = Net_Model(t, u);  u: [num_vars, Nx, Ny] float32."""
    del t  # TODO(synk): time-dependent BCs not implemented (static zero-flux assumed).
    V, Nx, Ny = u.shape
    H = params["flux_w1"].shape[1]
    N = Nx * Ny

    # Wrapper-side layout plumbing (all tiny / free): lane-dense flattened state, packed
    # weights, packed per-variable scalars, precomputed column index for boundary masks.
    u_flat = u.reshape(V, N)
    col_idx = jnp.tile(jnp.arange(Ny, dtype=jnp.int32), Nx).reshape(1, N)
    w_packed = jnp.stack(
        [params["flux_w1"], params["flux_b1"], params["flux_w2"],
         params["state_w1"], params["state_b1"], params["state_w2"]],
        axis=-1).astype(jnp.float32)                               # (V, H, 6)
    scal = jnp.stack(
        [params["flux_b2"], params["D_eff"], params["state_b2"]],
        axis=-1).astype(jnp.float32)                               # (V, 3)

    kernel = functools.partial(
        _net_model_kernel,
        ny=Ny,
        flux_calc_idx=tuple(int(i) for i in cfg.flux_calc_idx),
        flux_couple_idx=tuple(int(i) for i in cfg.flux_couple_idx),
        state_couple_idx=tuple(int(i) for i in cfg.state_couple_idx),
    )

    du_flat = pl.pallas_call(
        kernel,
        out_shape=jax.ShapeDtypeStruct((V, N), jnp.float32),
        in_specs=[
            pl.BlockSpec(memory_space=pltpu.MemorySpace.VMEM),   # u_flat  (one DMA)
            pl.BlockSpec(memory_space=pltpu.MemorySpace.VMEM),   # col_idx
            pl.BlockSpec(memory_space=pltpu.MemorySpace.VMEM),   # packed MLP weights
            pl.BlockSpec(memory_space=pltpu.MemorySpace.SMEM),   # per-variable scalars
        ],
        out_specs=pl.BlockSpec(memory_space=pltpu.MemorySpace.VMEM),
    )(u_flat, col_idx, w_packed, scal)

    return du_flat.reshape(V, Nx, Ny)


def net_model_reference(t, u, params, cfg):
    """Pure-JAX reference of the same forward pass (exact sigmoid, 2-D stencil)."""
    del t
    V, Nx, Ny = u.shape
    row = jnp.arange(Nx)[:, None]
    col = jnp.arange(Ny)[None, :]
    outs = []
    for v in range(V):
        um = u[cfg.flux_calc_idx[v]]
        uf = u[cfg.flux_couple_idx[v]]
        us = u[cfg.state_couple_idx[v]]

        h = jnp.tanh(uf[None] * params["flux_w1"][v][:, None, None]
                     + params["flux_b1"][v][:, None, None])
        z = jnp.sum(h * params["flux_w2"][v][:, None, None], axis=0) + params["flux_b2"][v]
        ret = jax.nn.sigmoid(z)

        up = jnp.where(row == 0, um, jnp.roll(um, 1, axis=0))
        down = jnp.where(row == Nx - 1, um, jnp.roll(um, -1, axis=0))
        left = jnp.where(col == 0, um, jnp.roll(um, 1, axis=1))
        right = jnp.where(col == Ny - 1, um, jnp.roll(um, -1, axis=1))
        lap = up + down + left + right - 4.0 * um
        flux = params["D_eff"][v] * ret * lap

        hs = jnp.tanh(us[None] * params["state_w1"][v][:, None, None]
                      + params["state_b1"][v][:, None, None])
        react = (jnp.sum(hs * params["state_w2"][v][:, None, None], axis=0)
                 + params["state_b2"][v])
        outs.append(flux + react)
    return jnp.stack(outs)


def init_params(key, num_vars, hidden):
    ks = jax.random.split(key, 8)
    f32 = jnp.float32
    return dict(
        flux_w1=0.5 * jax.random.normal(ks[0], (num_vars, hidden), f32),
        flux_b1=0.1 * jax.random.normal(ks[1], (num_vars, hidden), f32),
        flux_w2=0.5 * jax.random.normal(ks[2], (num_vars, hidden), f32),
        flux_b2=0.1 * jax.random.normal(ks[3], (num_vars,), f32),
        D_eff=jnp.linspace(0.05, 0.1, num_vars, dtype=f32),
        state_w1=0.5 * jax.random.normal(ks[4], (num_vars, hidden), f32),
        state_b1=0.1 * jax.random.normal(ks[5], (num_vars, hidden), f32),
        state_w2=0.5 * jax.random.normal(ks[6], (num_vars, hidden), f32),
        state_b2=0.1 * jax.random.normal(ks[7], (num_vars,), f32),
    )


if __name__ == "__main__":
    V, Nx, Ny, H = 2, 16, 16, 32   # num_features=2, spatial 16x16, MLP hidden=32
    cfg = SimpleNamespace(
        flux_calc_idx=[0, 1],
        flux_couple_idx=[1, 0],
        state_couple_idx=[1, 0],
    )

    key = jax.random.PRNGKey(0)
    k_u, k_p = jax.random.split(key)
    u = jax.random.uniform(k_u, (V, Nx, Ny), jnp.float32)
    params = init_params(k_p, V, H)
    t = jnp.float32(0.0)

    fwd = jax.jit(functools.partial(net_model_forward, cfg=cfg))
    du = jax.block_until_ready(fwd(t, u, params))

    ref = net_model_reference(t, u, params, cfg)
    assert du.shape == (V, Nx, Ny) and du.dtype == jnp.float32
    max_err = float(jnp.max(jnp.abs(du - ref)))
    # 1e-3 tolerance: pl.reciprocal(approx=True) in the sigmoid is only ~1e-4 accurate.
    assert jnp.allclose(du, ref, atol=1e-3, rtol=1e-3), f"max_err={max_err}"
    print("KERNEL_OK")
</pallas_src>

<mosaic_0001>
module attributes {stable_mosaic.version = 11 : i64} {
  func.func @_net_model_kernel(%arg0: memref<2x256xf32, #tpu.memory_space<vmem>>, %arg1: memref<1x256xi32, #tpu.memory_space<vmem>>, %arg2: memref<2x32x6xf32, #tpu.memory_space<vmem>>, %arg3: memref<2x3xf32, #tpu.memory_space<smem>>, %arg4: memref<2x256xf32, #tpu.memory_space<vmem>>) attributes {dimension_semantics = [], scalar_prefetch = 0 : i64, scratch_operands = 0 : i64, tpu.core_type = #tpu.core_type<tc>} {
    %0 = tpu.iota {dimensions = array<i32: 1>} : vector<1x256xi32>
    %c0 = arith.constant 0 : index
    %c0_0 = arith.constant 0 : index
    %1 = vector.load %arg1[%c0, %c0_0] : memref<1x256xi32, #tpu.memory_space<vmem>>, vector<1x256xi32>
    %c16_i32 = arith.constant 16 : i32
    %2 = vector.broadcast %c16_i32 : i32 to vector<1x256xi32>
    %3 = arith.cmpi sge, %0, %2 : vector<1x256xi32>
    %c240_i32 = arith.constant 240 : i32
    %4 = vector.broadcast %c240_i32 : i32 to vector<1x256xi32>
    %5 = arith.cmpi slt, %0, %4 : vector<1x256xi32>
    %c0_i32 = arith.constant 0 : i32
    %6 = vector.broadcast %c0_i32 : i32 to vector<1x256xi32>
    %7 = arith.cmpi sgt, %1, %6 : vector<1x256xi32>
    %c15_i32 = arith.constant 15 : i32
    %8 = vector.broadcast %c15_i32 : i32 to vector<1x256xi32>
    %9 = arith.cmpi slt, %1, %8 : vector<1x256xi32>
    %c0_1 = arith.constant 0 : index
    %c0_2 = arith.constant 0 : index
    %10 = vector.load %arg0[%c0_1, %c0_2] : memref<2x256xf32, #tpu.memory_space<vmem>>, vector<1x256xf32>
    %c1 = arith.constant 1 : index
    %c0_3 = arith.constant 0 : index
    %11 = vector.load %arg0[%c1, %c0_3] : memref<2x256xf32, #tpu.memory_space<vmem>>, vector<1x256xf32>
    %c1_4 = arith.constant 1 : index
    %c0_5 = arith.constant 0 : index
    %12 = vector.load %arg0[%c1_4, %c0_5] : memref<2x256xf32, #tpu.memory_space<vmem>>, vector<1x256xf32>
    %c0_6 = arith.constant 0 : index
    %c0_7 = arith.constant 0 : index
    %c0_8 = arith.constant 0 : index
    %13 = vector.load %arg2[%c0_6, %c0_7, %c0_8] : memref<2x32x6xf32, #tpu.memory_space<vmem>>, vector<1x32x6xf32>
    %14 = vector.shape_cast %13 : vector<1x32x6xf32> to vector<32x6xf32>
    %15 = vector.extract_strided_slice %14 {offsets = [0, 0], sizes = [32, 1], strides = [1, 1]} : vector<32x6xf32> to vector<32x1xf32>
    %16 = vector.extract_strided_slice %14 {offsets = [0, 1], sizes = [32, 1], strides = [1, 1]} : vector<32x6xf32> to vector<32x1xf32>
    %17 = vector.extract_strided_slice %14 {offsets = [0, 2], sizes = [32, 1], strides = [1, 1]} : vector<32x6xf32> to vector<32x1xf32>
    %18 = vector.extract_strided_slice %14 {offsets = [0, 3], sizes = [32, 1], strides = [1, 1]} : vector<32x6xf32> to vector<32x1xf32>
    %19 = vector.extract_strided_slice %14 {offsets = [0, 4], sizes = [32, 1], strides = [1, 1]} : vector<32x6xf32> to vector<32x1xf32>
    %20 = vector.extract_strided_slice %14 {offsets = [0, 5], sizes = [32, 1], strides = [1, 1]} : vector<32x6xf32> to vector<32x1xf32>
    %c0_9 = arith.constant 0 : index
    %c0_10 = arith.constant 0 : index
    %21 = memref.load %arg3[%c0_9, %c0_10] : memref<2x3xf32, #tpu.memory_space<smem>>
    %c0_11 = arith.constant 0 : index
    %c1_12 = arith.constant 1 : index
    %22 = memref.load %arg3[%c0_11, %c1_12] : memref<2x3xf32, #tpu.memory_space<smem>>
    %c0_13 = arith.constant 0 : index
    %c2 = arith.constant 2 : index
    %23 = memref.load %arg3[%c0_13, %c2] : memref<2x3xf32, #tpu.memory_space<smem>>
    %24 = vector.broadcast %11 : vector<1x256xf32> to vector<32x256xf32>
    %25 = vector.broadcast %15 : vector<32x1xf32> to vector<32x256xf32>
    %26 = arith.mulf %24, %25 : vector<32x256xf32>
    %27 = vector.broadcast %16 : vector<32x1xf32> to vector<32x256xf32>
    %28 = arith.addf %26, %27 : vector<32x256xf32>
    %29 = math.tanh %28 : vector<32x256xf32>
    %30 = vector.broadcast %17 : vector<32x1xf32> to vector<32x256xf32>
    %31 = arith.mulf %29, %30 : vector<32x256xf32>
    %cst = arith.constant dense<0.000000e+00> : vector<256xf32>
    %32 = vector.multi_reduction <add>, %31, %cst [0] : vector<32x256xf32> to vector<256xf32>
    %33 = vector.shape_cast %32 : vector<256xf32> to vector<1x256xf32>
    %34 = vector.broadcast %21 : f32 to vector<1x256xf32>
    %35 = arith.addf %33, %34 : vector<1x256xf32>
    %cst_14 = arith.constant 0.000000e+00 : f32
    %36 = vector.broadcast %cst_14 : f32 to vector<1x256xf32>
    %37 = arith.subf %36, %35 : vector<1x256xf32>
    %38 = math.exp %37 : vector<1x256xf32>
    %cst_15 = arith.constant 1.000000e+00 : f32
    %39 = vector.broadcast %cst_15 : f32 to vector<1x256xf32>
    %40 = arith.addf %39, %38 : vector<1x256xf32>
    %41 = tpu.reciprocal %40 {approx = true} : vector<1x256xf32> -> vector<1x256xf32>
    %c16_i32_16 = arith.constant 16 : i32
    %42 = tpu.dynamic_rotate %10 by %c16_i32_16 dim 1 : vector<1x256xf32>, i32 -> vector<1x256xf32>
    %43 = arith.select %3, %42, %10 : vector<1x256xi1>, vector<1x256xf32>
    %c240_i32_17 = arith.constant 240 : i32
    %44 = tpu.dynamic_rotate %10 by %c240_i32_17 dim 1 : vector<1x256xf32>, i32 -> vector<1x256xf32>
    %45 = arith.select %5, %44, %10 : vector<1x256xi1>, vector<1x256xf32>
    %c1_i32 = arith.constant 1 : i32
    %46 = tpu.dynamic_rotate %10 by %c1_i32 dim 1 : vector<1x256xf32>, i32 -> vector<1x256xf32>
    %47 = arith.select %7, %46, %10 : vector<1x256xi1>, vector<1x256xf32>
    %c255_i32 = arith.constant 255 : i32
    %48 = tpu.dynamic_rotate %10 by %c255_i32 dim 1 : vector<1x256xf32>, i32 -> vector<1x256xf32>
    %49 = arith.select %9, %48, %10 : vector<1x256xi1>, vector<1x256xf32>
    %50 = arith.addf %43, %45 : vector<1x256xf32>
    %51 = arith.addf %50, %47 : vector<1x256xf32>
    %52 = arith.addf %51, %49 : vector<1x256xf32>
    %cst_18 = arith.constant 4.000000e+00 : f32
    %53 = vector.broadcast %cst_18 : f32 to vector<1x256xf32>
    %54 = arith.mulf %53, %10 : vector<1x256xf32>
    %55 = arith.subf %52, %54 : vector<1x256xf32>
    %56 = vector.broadcast %22 : f32 to vector<1x256xf32>
    %57 = arith.mulf %56, %41 : vector<1x256xf32>
    %58 = arith.mulf %57, %55 : vector<1x256xf32>
    %59 = vector.broadcast %12 : vector<1x256xf32> to vector<32x256xf32>
    %60 = vector.broadcast %18 : vector<32x1xf32> to vector<32x256xf32>
    %61 = arith.mulf %59, %60 : vector<32x256xf32>
    %62 = vector.broadcast %19 : vector<32x1xf32> to vector<32x256xf32>
    %63 = arith.addf %61, %62 : vector<32x256xf32>
    %64 = math.tanh %63 : vector<32x256xf32>
    %65 = vector.broadcast %20 : vector<32x1xf32> to vector<32x256xf32>
    %66 = arith.mulf %64, %65 : vector<32x256xf32>
    %cst_19 = arith.constant dense<0.000000e+00> : vector<256xf32>
    %67 = vector.multi_reduction <add>, %66, %cst_19 [0] : vector<32x256xf32> to vector<256xf32>
    %68 = vector.shape_cast %67 : vector<256xf32> to vector<1x256xf32>
    %69 = vector.broadcast %23 : f32 to vector<1x256xf32>
    %70 = arith.addf %68, %69 : vector<1x256xf32>
    %71 = arith.addf %58, %70 : vector<1x256xf32>
    %c0_20 = arith.constant 0 : index
    %c0_21 = arith.constant 0 : index
    %72 = vector.load %arg4[%c0_20, %c0_21] : memref<2x256xf32, #tpu.memory_space<vmem>>, vector<1x256xf32>
    tpu.vector_store %arg4[%c0_20, %c0_21], %71 {strides = array<i32>} : memref<2x256xf32, #tpu.memory_space<vmem>>, vector<1x256xf32>,
    %c1_22 = arith.constant 1 : index
    %c0_23 = arith.constant 0 : index
    %73 = vector.load %arg0[%c1_22, %c0_23] : memref<2x256xf32, #tpu.memory_space<vmem>>, vector<1x256xf32>
    %c0_24 = arith.constant 0 : index
    %c0_25 = arith.constant 0 : index
    %74 = vector.load %arg0[%c0_24, %c0_25] : memref<2x256xf32, #tpu.memory_space<vmem>>, vector<1x256xf32>
    %c0_26 = arith.constant 0 : index
    %c0_27 = arith.constant 0 : index
    %75 = vector.load %arg0[%c0_26, %c0_27] : memref<2x256xf32, #tpu.memory_space<vmem>>, vector<1x256xf32>
    %c1_28 = arith.constant 1 : index
    %c0_29 = arith.constant 0 : index
    %c0_30 = arith.constant 0 : index
    %76 = vector.load %arg2[%c1_28, %c0_29, %c0_30] : memref<2x32x6xf32, #tpu.memory_space<vmem>>, vector<1x32x6xf32>
    %77 = vector.shape_cast %76 : vector<1x32x6xf32> to vector<32x6xf32>
    %78 = vector.extract_strided_slice %77 {offsets = [0, 0], sizes = [32, 1], strides = [1, 1]} : vector<32x6xf32> to vector<32x1xf32>
    %79 = vector.extract_strided_slice %77 {offsets = [0, 1], sizes = [32, 1], strides = [1, 1]} : vector<32x6xf32> to vector<32x1xf32>
    %80 = vector.extract_strided_slice %77 {offsets = [0, 2], sizes = [32, 1], strides = [1, 1]} : vector<32x6xf32> to vector<32x1xf32>
    %81 = vector.extract_strided_slice %77 {offsets = [0, 3], sizes = [32, 1], strides = [1, 1]} : vector<32x6xf32> to vector<32x1xf32>
    %82 = vector.extract_strided_slice %77 {offsets = [0, 4], sizes = [32, 1], strides = [1, 1]} : vector<32x6xf32> to vector<32x1xf32>
    %83 = vector.extract_strided_slice %77 {offsets = [0, 5], sizes = [32, 1], strides = [1, 1]} : vector<32x6xf32> to vector<32x1xf32>
    %c1_31 = arith.constant 1 : index
    %c0_32 = arith.constant 0 : index
    %84 = memref.load %arg3[%c1_31, %c0_32] : memref<2x3xf32, #tpu.memory_space<smem>>
    %c1_33 = arith.constant 1 : index
    %c1_34 = arith.constant 1 : index
    %85 = memref.load %arg3[%c1_33, %c1_34] : memref<2x3xf32, #tpu.memory_space<smem>>
    %c1_35 = arith.constant 1 : index
    %c2_36 = arith.constant 2 : index
    %86 = memref.load %arg3[%c1_35, %c2_36] : memref<2x3xf32, #tpu.memory_space<smem>>
    %87 = vector.broadcast %74 : vector<1x256xf32> to vector<32x256xf32>
    %88 = vector.broadcast %78 : vector<32x1xf32> to vector<32x256xf32>
    %89 = arith.mulf %87, %88 : vector<32x256xf32>
    %90 = vector.broadcast %79 : vector<32x1xf32> to vector<32x256xf32>
    %91 = arith.addf %89, %90 : vector<32x256xf32>
    %92 = math.tanh %91 : vector<32x256xf32>
    %93 = vector.broadcast %80 : vector<32x1xf32> to vector<32x256xf32>
    %94 = arith.mulf %92, %93 : vector<32x256xf32>
    %cst_37 = arith.constant dense<0.000000e+00> : vector<256xf32>
    %95 = vector.multi_reduction <add>, %94, %cst_37 [0] : vector<32x256xf32> to vector<256xf32>
    %96 = vector.shape_cast %95 : vector<256xf32> to vector<1x256xf32>
    %97 = vector.broadcast %84 : f32 to vector<1x256xf32>
    %98 = arith.addf %96, %97 : vector<1x256xf32>
    %cst_38 = arith.constant 0.000000e+00 : f32
    %99 = vector.broadcast %cst_38 : f32 to vector<1x256xf32>
    %100 = arith.subf %99, %98 : vector<1x256xf32>
    %101 = math.exp %100 : vector<1x256xf32>
    %cst_39 = arith.constant 1.000000e+00 : f32
    %102 = vector.broadcast %cst_39 : f32 to vector<1x256xf32>
    %103 = arith.addf %102, %101 : vector<1x256xf32>
    %104 = tpu.reciprocal %103 {approx = true} : vector<1x256xf32> -> vector<1x256xf32>
    %c16_i32_40 = arith.constant 16 : i32
    %105 = tpu.dynamic_rotate %73 by %c16_i32_40 dim 1 : vector<1x256xf32>, i32 -> vector<1x256xf32>
    %106 = arith.select %3, %105, %73 : vector<1x256xi1>, vector<1x256xf32>
    %c240_i32_41 = arith.constant 240 : i32
    %107 = tpu.dynamic_rotate %73 by %c240_i32_41 dim 1 : vector<1x256xf32>, i32 -> vector<1x256xf32>
    %108 = arith.select %5, %107, %73 : vector<1x256xi1>, vector<1x256xf32>
    %c1_i32_42 = arith.constant 1 : i32
    %109 = tpu.dynamic_rotate %73 by %c1_i32_42 dim 1 : vector<1x256xf32>, i32 -> vector<1x256xf32>
    %110 = arith.select %7, %109, %73 : vector<1x256xi1>, vector<1x256xf32>
    %c255_i32_43 = arith.constant 255 : i32
    %111 = tpu.dynamic_rotate %73 by %c255_i32_43 dim 1 : vector<1x256xf32>, i32 -> vector<1x256xf32>
    %112 = arith.select %9, %111, %73 : vector<1x256xi1>, vector<1x256xf32>
    %113 = arith.addf %106, %108 : vector<1x256xf32>
    %114 = arith.addf %113, %110 : vector<1x256xf32>
    %115 = arith.addf %114, %112 : vector<1x256xf32>
    %cst_44 = arith.constant 4.000000e+00 : f32
    %116 = vector.broadcast %cst_44 : f32 to vector<1x256xf32>
    %117 = arith.mulf %116, %73 : vector<1x256xf32>
    %118 = arith.subf %115, %117 : vector<1x256xf32>
    %119 = vector.broadcast %85 : f32 to vector<1x256xf32>
    %120 = arith.mulf %119, %104 : vector<1x256xf32>
    %121 = arith.mulf %120, %118 : vector<1x256xf32>
    %122 = vector.broadcast %75 : vector<1x256xf32> to vector<32x256xf32>
    %123 = vector.broadcast %81 : vector<32x1xf32> to vector<32x256xf32>
    %124 = arith.mulf %122, %123 : vector<32x256xf32>
    %125 = vector.broadcast %82 : vector<32x1xf32> to vector<32x256xf32>
    %126 = arith.addf %124, %125 : vector<32x256xf32>
    %127 = math.tanh %126 : vector<32x256xf32>
    %128 = vector.broadcast %83 : vector<32x1xf32> to vector<32x256xf32>
    %129 = arith.mulf %127, %128 : vector<32x256xf32>
    %cst_45 = arith.constant dense<0.000000e+00> : vector<256xf32>
    %130 = vector.multi_reduction <add>, %129, %cst_45 [0] : vector<32x256xf32> to vector<256xf32>
    %131 = vector.shape_cast %130 : vector<256xf32> to vector<1x256xf32>
    %132 = vector.broadcast %86 : f32 to vector<1x256xf32>
    %133 = arith.addf %131, %132 : vector<1x256xf32>
    %134 = arith.addf %121, %133 : vector<1x256xf32>
    %c1_46 = arith.constant 1 : index
    %c0_47 = arith.constant 0 : index
    %135 = vector.load %arg4[%c1_46, %c0_47] : memref<2x256xf32, #tpu.memory_space<vmem>>, vector<1x256xf32>
    tpu.vector_store %arg4[%c1_46, %c0_47], %134 {strides = array<i32>} : memref<2x256xf32, #tpu.memory_space<vmem>>, vector<1x256xf32>,
    return
  }
}

</mosaic_0001>

<bundles_post_ra>
// kernel: tile.9
= control target key start
LH: loop header
LB: loop body
LE: loop exit
PB: predicated region body
PF: predicated region fallthrough
CT: control target
= control target key end

     0   :  { %s7_s6 = smov 3  ;;  %s21_s9 = smov 3  ;;  %vm4_vm0 = vcmask 130048   ;;  %vm11_vm1 = vcmask 1048448   ;;  %vm18_vm2 = vcmask 917248   ;;  %vm25_vm3 = vcmask 786048   ;;  %s129_s0 = inlined_call_operand.vmem [shape: s32[16,16], index: 0, kind: input, shape index: {}]   ;;  %s130_s1 = inlined_call_operand.vmem [shape: s32[1,256], index: 1, kind: output, shape index: {}]  }
   0x1   :  { %v67_v0 = vld [vmem:[%s129_s0 + $0x7] ss:$8 sm:%s7_s6]   ;;  %s82_s10 = smov 112   ;;  %v69_v1 = vld [vmem:[%s129_s0 + $0x5] ss:$8 sm:%s21_s9]   ;;  %s83_s13 = smov 80  }
   0x2   :  { %9 = vrot.lane.b32.xlu0 %v67_v0, %s82_s10  ;;  %23 = vrot.lane.b32.xlu1 %v69_v1, %s83_s13  ;;  %s14_s14 = smov 3  ;;  %s28_s15 = smov 3  ;;  %vm32_vm4 = vcmask 654848   ;;  %vm39_vm5 = vcmask 523648   ;;  %vm46_vm6 = vcmask 392448   ;;  %vm53_vm7 = vcmask 261248  }
   0x3   :  { %s35_s16 = smov 3  ;;  %v68_v3 = vld [vmem:[%s129_s0 + $0x6] ss:$8 sm:%s14_s14]   ;;  %s84_s21 = smov 48   ;;  %v70_v4 = vld [vmem:[%s129_s0 + $0x4] ss:$8 sm:%s28_s15]  }
   0x4   :  { %v71_v2 = vld [vmem:[%s129_s0 + $0x3] ss:$8 sm:%s35_s16]   ;;  %s42_s24 = smov 3  ;;  %s85_s25 = smov 96  }
   0x5   :  { %37 = vrot.lane.b32.xlu2 %v71_v2, %s84_s21  ;;  %s86_s26 = smov 64   ;;  %s49_s27 = smov 3  ;;  %v72_v5 = vld [vmem:[%s129_s0 + $0x2] ss:$8 sm:%s42_s24]  }
   0x6   :  { %v73_v6 = vld [vmem:[%s129_s0 + $0x1] ss:$8 sm:%s49_s27]   ;;  %s87_s3 = smov 32   ;;  %s88_s4 = smov 16  }
   0x7   :  { %s2_s5 = smov 3 }
   0x8   :  { %v3_v7 = vld [vmem:[%s129_s0] ss:$8 sm:%s2_s5]  }
   0x9   :  { %5 = vst.msk [vmem:[#allocation0] ss:$8 sm:$0x3] %vm4_vm0, %v3_v7  }
   0xa   :  { %16 = vrot.lane.b32.xlu0 %v68_v3, %s85_s25  ;;  %30 = vrot.lane.b32.xlu1 %v70_v4, %s86_s26 }
   0xd   :  { %44 = vrot.lane.b32.xlu2 %v72_v5, %s87_s3 }
  0x12   :  { %51 = vrot.lane.b32.xlu0 %v73_v6, %s88_s4 }
  0x5f   :  { %v38_v8 = vpop.permute.xlu2 %37  }
  0x67   :  { %v45_v9 = vpop.permute.xlu2 %44  }
  0x74   :  { %v10_v10 = vpop.permute.xlu0 %9   ;;  %v24_v11 = vpop.permute.xlu1 %23  }
  0x75   :  { %12 = vst.msk [vmem:[#allocation0] ss:$8 sm:$0x3] %vm11_vm1, %v10_v10  }
  0x7c   :  { %v17_v12 = vpop.permute.xlu0 %16   ;;  %v31_v13 = vpop.permute.xlu1 %30  }
  0x7d   :  { %19 = vst.msk [vmem:[#allocation0] ss:$8 sm:$0x3] %vm18_vm2, %v17_v12  }
  0x7e   :  { %26 = vst.msk [vmem:[#allocation0] ss:$8 sm:$0x3] %vm25_vm3, %v24_v11  }
  0x7f   :  { %33 = vst.msk [vmem:[#allocation0] ss:$8 sm:$0x3] %vm32_vm4, %v31_v13  }
  0x80   :  { %40 = vst.msk [vmem:[#allocation0] ss:$8 sm:$0x3] %vm39_vm5, %v38_v8  }
  0x81   :  { %47 = vst.msk [vmem:[#allocation0] ss:$8 sm:$0x3] %vm46_vm6, %v45_v9  }
  0x84   :  { %v52_v14 = vpop.permute.xlu0 %51  }
  0x85   :  { %54 = vst.msk [vmem:[#allocation0] ss:$8 sm:$0x3] %vm53_vm7, %v52_v14  }
  0x8c   :  { %v57_v15 = vld [vmem:[#allocation0] sm:$0x1]  ;;  %v62_v16 = vld [vmem:[#allocation0 + $0x8] sm:$0x1] }
  0x8d   :  { %60 = vst [vmem:[%s130_s1] sm:$0x1] %v57_v15 }
  0x8e   :  { %74 = vst [vmem:[%s130_s1 + $0x1] sm:$0x1] %v62_v16 }

// kernel: net_model_forward.1
= control target key start
LH: loop header
LB: loop body
LE: loop exit
PB: predicated region body
PF: predicated region fallthrough
CT: control target
= control target key end

     0   :  { %9 = vsyncpa [#allocation3], 0  ;;  %s828_s18 = smov [#allocation2]   ;;  %s1281_s0 = inlined_call_operand.vmem [shape: f32[2,256], index: 0, kind: input, shape index: {}]   ;;  %s1282_s1 = inlined_call_operand.vmem [shape: s32[1,256], index: 1, kind: input, shape index: {}]   ;;  %s1283_s2 = inlined_call_operand.vmem [shape: f32[2,32,6], index: 2, kind: input, shape index: {}]   ;;  %s1284_s3 = inlined_call_operand.vmem [shape: f32[2,3], index: 3, kind: input, shape index: {}]   ;;  %s1285_s4 = inlined_call_operand.vmem [shape: f32[2,256], index: 4, kind: output, shape index: {}]  }
   0x1   :  { %s21_s17 = sshll.u32 %s1284_s3, 4  ;;  %s22_s17 = int_to_ptr.vmem [resolvable:$true] %s21_s17 }
   0x2   :  { %24 = dma.vmem_to_smem %s22_s17, 32, %s828_s18, [#allocation3]  }
   0x3   :  { %826 = dma.done.wait [#allocation3], 32  }
   0x4   :  { %827 = vsyncadd [#allocation3], 4294967264 }
   0x5   :  { %29 = sfence }
   0x6   :  { %v870_v0 = vld [vmem:[%s1283_s2 + $0x10] sm:$0xff]  ;;  %v875_v1 = vld [vmem:[%s1283_s2] sm:$0xff]  ;;  %v829_v2 = vmov 1   ;;  %v830_v3 = vmov 0   ;;  %v886_v4 = vld [vmem:[%s1283_s2 + $0x18] sm:$0xff]  ;;  %v831_v8 = vmov 2   ;;  %v30_v43 = vlaneseq }
   0x7   :  { %706 = vset.pattern.permute.xlu2 %v829_v2  ;;  %705 = vset.pattern.permute.xlu1 %v830_v3  ;;  %v44_v5 = vld [vmem:[%s1283_s2 + $0x8] sm:$0xff]  ;;  %v895_v6 = vld [vmem:[%s1281_s0] ss:$2 sm:$0x3]  ;;  %s832_s28 = smov 1   ;;  %s833_s29 = smov 127  }
   0x8   :  { %704 = vset.pattern.permute.xlu0 %v830_v3  ;;  %67 = vperm.xlu1 %705, %v870_v0   ;;  %v898_v7 = vperm.slane %v895_v6, 0  ;;  %v907_v9 = vperm.slane %v895_v6, 1  ;;  %v916_v10 = vld [vmem:[%s1283_s2 + $0x20] sm:$0xff]  ;;  %s834_s6 = smov 16   ;;  %v835_v11 = vmov 3   ;;  %s836_s7 = smov 112  }
   0x9   :  { %84 = vperm.xlu2 %706, %v875_v1   ;;  %57 = vperm.xlu0 %704, %v875_v1   ;;  %v934_v12 = vld [vmem:[%s1283_s2 + $0x28] sm:$0xff]  ;;  %v947_v13 = vld [vmem:[%s1283_s2 + $0x30] sm:$0xff]  ;;  %v837_v14 = vmov 4   ;;  %v960_v15 = vld [vmem:[%s1281_s0 + $0x1] ss:$2 sm:$0x3] }
   0xa   :  { %v963_v16 = vperm.slane %v960_v15, 1  ;;  %v838_v17 = vmov 5   ;;  %v971_v18 = vperm.slane %v960_v15, 0  ;;  %v986_v21 = vld [vmem:[%s1283_s2 + $0x38] sm:$0xff]  ;;  %v1027_v44 = vand.u32 127, %v30_v43  ;;  %s682_s19 = sld [smem:[#allocation2 + $0x1]] }
   0xb   :  { %v681_v23 = vld [vmem:[%s1281_s0 + $0x1] ss:$2 sm:$0x3]  ;;  %vm203_vm1 = vcmask 1040384   ;;  %vm1209_vm9 = vcmp.lt.s32.totalorder %v30_v43, 256  ;;  %s689_s22 = sld [smem:[#allocation2 + $0x80]] }
   0xc   :  { %v997_v25 = vperm.slane %v681_v23, 0  ;;  %v999_v26 = vperm.slane %v681_v23, 1  ;;  %vm211_vm0 = vcmp.lt.s32.totalorder %v1027_v44, 127  ;;  %vm179_vm2 = vcmp.lt.s32.totalorder %v1027_v44, 16  ;;  %s690_s24 = sld [smem:[#allocation2 + $0x81]] }
   0xd   :  { %vm34_vm3 = vcmp.ge.s32.totalorder %v1027_v44, 16  ;;  %vm188_vm4 = vcmp.lt.s32.totalorder %v1027_v44, 112  ;;  %vm197_vm6 = vcmp.lt.s32.totalorder %v1027_v44, 1  ;;  %s691_s25 = sld [smem:[#allocation2 + $0x82]] }
  0x10   :  { %72 = vperm.xlu1 %705, %v886_v4  }
  0x11   :  { %88 = vperm.xlu2 %706, %v44_v5   ;;  %62 = vperm.xlu0 %704, %v44_v5  }
  0x18   :  { %707 = vset.pattern.permute.xlu1 %v829_v2 }
  0x19   :  { %708 = vset.pattern.permute.xlu2 %v831_v8  ;;  %193 = vrot.lane.b32.xlu0 %v898_v7, %s832_s28 }
  0x1a   :  { %96 = vperm.xlu1 %707, %v886_v4   ;;  %116 = vperm.xlu2 %708, %v875_v1  }
  0x21   :  { %209 = vrot.lane.b32.xlu0 %v907_v9, %s833_s29 }
  0x22   :  { %709 = vset.pattern.permute.xlu1 %v831_v8  ;;  %124 = vperm.xlu2 %708, %v870_v0  }
  0x23   :  { %120 = vperm.xlu1 %709, %v44_v5  }
  0x29   :  { %379 = vperm.xlu0 %704, %v916_v10  }
  0x2a   :  { %177 = vrot.lane.b32.xlu2 %v907_v9, %s834_s6 }
  0x2b   :  { %175 = vrot.lane.b32.xlu1 %v898_v7, %s834_s6  ;;  %711 = vset.pattern.permute.xlu2 %v835_v11 }
  0x2c   :  { %710 = vset.pattern.permute.xlu1 %v835_v11 }
  0x31   :  { %716 = vset.pattern.permute.xlu0 %v829_v2 }
  0x32   :  { %186 = vrot.lane.b32.xlu2 %v907_v9, %s836_s7  ;;  %92 = vperm.xlu0 %716, %v870_v0  }
  0x33   :  { %184 = vrot.lane.b32.xlu1 %v898_v7, %s836_s7 }
  0x3a   :  { %207 = vrot.lane.b32.xlu2 %v898_v7, %s833_s29  ;;  %410 = vperm.xlu0 %716, %v934_v12  }
  0x3b   :  { %195 = vrot.lane.b32.xlu1 %v907_v9, %s832_s28 }
  0x42   :  { %254 = vperm.xlu2 %711, %v44_v5   ;;  %720 = vset.pattern.permute.xlu0 %v831_v8 }
  0x43   :  { %128 = vperm.xlu0 %720, %v886_v4   ;;  %250 = vperm.xlu1 %710, %v875_v1  }
  0x4a   :  { %712 = vset.pattern.permute.xlu2 %v837_v14 }
  0x4b   :  { %274 = vperm.xlu2 %712, %v875_v1   ;;  %446 = vperm.xlu0 %720, %v947_v13  }
  0x4c   :  { %262 = vperm.xlu1 %710, %v886_v4  }
  0x53   :  { %282 = vperm.xlu2 %712, %v870_v0   ;;  %724 = vset.pattern.permute.xlu0 %v835_v11 }
  0x54   :  { %713 = vset.pattern.permute.xlu1 %v837_v14  ;;  %258 = vperm.xlu0 %724, %v870_v0  }
  0x55   :  { %278 = vperm.xlu1 %713, %v44_v5  }
  0x5b   :  { %715 = vset.pattern.permute.xlu2 %v838_v17 }
  0x5c   :  { %310 = vperm.xlu2 %715, %v44_v5   ;;  %507 = vrot.lane.b32.xlu0 %v963_v16, %s836_s7 }
  0x5d   :  { %714 = vset.pattern.permute.xlu1 %v838_v17 }
  0x5e   :  { %306 = vperm.xlu1 %714, %v875_v1  }
  0x63   :  { %v85_v19 = vpop.permute.xlu2 %84 }
  0x64   :  { %318 = vperm.xlu2 %715, %v886_v4   ;;  %525 = vrot.lane.b32.xlu0 %v971_v18, %s833_s29 }
  0x66   :  { %314 = vperm.xlu1 %714, %v870_v0  }
  0x6b   :  { %v89_v20 = vpop.permute.xlu2 %88 }
  0x6c   :  { %718 = vset.pattern.permute.xlu2 %v830_v3  ;;  %575 = vperm.xlu0 %724, %v947_v13  }
  0x6d   :  { %389 = vperm.xlu2 %718, %v947_v13  }
  0x6e   :  { %717 = vset.pattern.permute.xlu1 %v830_v3 }
  0x6f   :  { %384 = vperm.xlu1 %717, %v934_v12  }
  0x74   :  { %727 = vset.pattern.permute.xlu0 %v837_v14  ;;  %v117_v22 = vpop.permute.xlu2 %116 }
  0x75   :  { %719 = vset.pattern.permute.xlu2 %v829_v2  ;;  %286 = vperm.xlu0 %727, %v886_v4  }
  0x76   :  { %406 = vperm.xlu2 %719, %v916_v10  }
  0x77   :  { %394 = vperm.xlu1 %717, %v986_v21  }
  0x7a   :  { %v995_v24 = vpop.permute.xlu1 %67 }
  0x7b   :  { %v58_v27 = vpop.permute.xlu0 %57  ;;  %v79_v3 = vmul.f32 %v995_v24, %v997_v25  ;;  %v80_v4 = vmul.f32 %v995_v24, %v999_v26 }
  0x7c   :  { %v75_v28 = vmul.f32 %v58_v27, %v997_v25  ;;  %v76_v29 = vmul.f32 %v58_v27, %v999_v26  ;;  %v1003_v30 = vpop.permute.xlu2 %124 }
  0x7d   :  { %603 = vperm.xlu0 %727, %v986_v21  }
  0x7e   :  { %v99_v31 = vadd.f32 %v85_v19, %v75_v28  ;;  %v100_v32 = vadd.f32 %v85_v19, %v76_v29  ;;  %418 = vperm.xlu2 %719, %v986_v21  }
  0x7f   :  { %721 = vset.pattern.permute.xlu1 %v829_v2  ;;  %v1052_v2 = vadd.s32 128, %v1027_v44 }
  0x80   :  { %414 = vperm.xlu1 %721, %v947_v13   ;;  %734 = vtanh.f32 %v99_v31 }
  0x81   :  { %736 = vtanh.f32 %v100_v32  ;;  %vm37_vm5 = vcmp.lt.s32.totalorder %v1052_v2, 240 }
  0x82   :  { %v1009_v33 = vpop.permute.xlu1 %72 }
  0x83   :  { %v63_v34 = vpop.permute.xlu0 %62  ;;  %v81_v31 = vmul.f32 %v1009_v33, %v997_v25 }
  0x84   :  { %v178_v35 = vpop.permute.xlu2 %177  ;;  %v77_v36 = vmul.f32 %v63_v34, %v997_v25  ;;  %v78_v37 = vmul.f32 %v63_v34, %v999_v26 }
  0x85   :  { %527 = vrot.lane.b32.xlu0 %v963_v16, %s833_s29 }
  0x86   :  { %723 = vset.pattern.permute.xlu2 %v831_v8  ;;  %733 = vset.pattern.permute.xlu0 %v838_v17  ;;  %v101_v38 = vadd.f32 %v89_v20, %v77_v36  ;;  %v102_v39 = vadd.f32 %v89_v20, %v78_v37  ;;  %v735_v45 = vpop.eup %734 }
  0x87   :  { %442 = vperm.xlu2 %723, %v934_v12   ;;  %v737_v46 = vpop.eup %736  ;;  %v131_v52 = vmul.f32 %v735_v45, %v117_v22 }
  0x88   :  { %722 = vset.pattern.permute.xlu1 %v831_v8  ;;  %738 = vtanh.f32 %v101_v38  ;;  %v132_v55 = vmul.f32 %v737_v46, %v117_v22 }
  0x89   :  { %438 = vperm.xlu1 %722, %v916_v10   ;;  %740 = vtanh.f32 %v102_v39 }
  0x8b   :  { %v1020_v40 = vpop.permute.xlu0 %193 }
  0x8c   :  { %v1022_v41 = vpop.permute.xlu1 %96  ;;  %v187_v42 = vpop.permute.xlu2 %186 }
  0x8d   :  { %v105_v34 = vadd.f32 %v1022_v41, %v81_v31 }
  0x8e   :  { %v739_v48 = vpop.eup %738 }
  0x8f   :  { %497 = vrot.lane.b32.xlu2 %v971_v18, %s834_s6  ;;  %v741_v50 = vpop.eup %740 }
  0x90   :  { %726 = vset.pattern.permute.xlu2 %v835_v11 }
  0x91   :  { %450 = vperm.xlu1 %722, %v986_v21  }
  0x93   :  { %v210_v47 = vpop.permute.xlu0 %209 }
  0x94   :  { %v208_v49 = vpop.permute.xlu2 %207 }
  0x95   :  { %v121_v51 = vpop.permute.xlu1 %120  ;;  %v212_v53 = vsel %vm211_vm0, %v208_v49, %v210_v47  ;;  %v213_v54 = vsel %vm211_vm0, %v210_v47, %v208_v49 }
  0x96   :  { %v133_v56 = vmul.f32 %v739_v48, %v121_v51  ;;  %v134_v57 = vmul.f32 %v741_v50, %v121_v51  ;;  %v216_v58 = vrot.slane %v213_v54, 7 }
  0x97   :  { %505 = vrot.lane.b32.xlu2 %v971_v18, %s836_s7 }
  0x98   :  { %v139_v59 = vadd.f32 %v133_v56, %v131_v52  ;;  %v148_v60 = vadd.f32 %v134_v57, %v132_v55  ;;  %v217_v61 = vsel %vm203_vm1, %v212_v53, %v216_v58 }
  0x99   :  { %499 = vrot.lane.b32.xlu1 %v963_v16, %s834_s6 }
  0x9a   :  { %725 = vset.pattern.permute.xlu1 %v835_v11 }
  0x9b   :  { %v1042_v62 = vpop.permute.xlu0 %379 }
  0x9c   :  { %v1062_v5 = vpop.permute.xlu2 %254 }
  0x9d   :  { %v176_v63 = vpop.permute.xlu1 %175 }
  0x9e   :  { %v180_v0 = vsel %vm179_vm2, %v176_v63, %v178_v35  ;;  %v181_v1 = vsel %vm179_vm2, %v178_v35, %v176_v63  ;;  %v1085_v35 = vld [vmem:[%s1282_s1] sm:$0x3]  ;;  %s47_s1 = sld [smem:[#allocation2]] }
  0x9f   :  { %515 = vrot.lane.b32.xlu2 %v963_v16, %s832_s28  ;;  %v182_v23 = vsel %vm34_vm3, %v181_v1, %v898_v7  ;;  %v82_v7 = vmul.f32 %v1009_v33, %v999_v26  ;;  %vm39_vm7 = vcmp.lt.s32.totalorder %v1085_v35, 15  ;;  %vm38_vm8 = vcmp.gt.s32.totalorder %v1085_v35, 0 }
  0xa0   :  { %v219_v48 = vsel %vm39_vm7, %v217_v61, %v895_v6  ;;  %v553_v35 = vmul.f32 4.0, %v960_v15 }
  0xa1   :  { %513 = vrot.lane.b32.xlu1 %v971_v18, %s832_s28  ;;  %v230_v52 = vperm.slane %v219_v48, 0 }
  0xa4   :  { %v93_v8 = vpop.permute.xlu0 %92 }
  0xa5   :  { %v103_v19 = vadd.f32 %v93_v8, %v79_v3  ;;  %v104_v20 = vadd.f32 %v93_v8, %v80_v4  ;;  %v185_v22 = vpop.permute.xlu1 %184  ;;  %v1092_v39 = vpop.permute.xlu2 %274 }
  0xa6   :  { %v189_v27 = vsel %vm188_vm4, %v185_v22, %v187_v42  ;;  %v190_v24 = vsel %vm188_vm4, %v187_v42, %v185_v22 }
  0xa7   :  { %742 = vtanh.f32 %v103_v19  ;;  %v192_v28 = vsel %vm37_vm5, %v190_v24, %v907_v9  ;;  %v220_v29 = vadd.f32 %v189_v27, %v182_v23  ;;  %571 = vperm.xlu2 %726, %v934_v12   ;;  %v106_v9 = vadd.f32 %v1022_v41, %v82_v7 }
  0xa8   :  { %744 = vtanh.f32 %v104_v20  ;;  %v221_v32 = vadd.f32 %v192_v28, %v180_v0 }
  0xa9   :  { %567 = vperm.xlu1 %725, %v916_v10   ;;  %746 = vtanh.f32 %v105_v34  ;;  %v157_v34 = vstv %s47_s1 }
  0xaa   :  { %748 = vtanh.f32 %v106_v9 }
  0xac   :  { %v1089_v36 = vpop.permute.xlu0 %410 }
  0xad   :  { %v743_v37 = vpop.eup %742  ;;  %v196_v38 = vpop.permute.xlu1 %195 }
  0xae   :  { %v745_v33 = vpop.eup %744  ;;  %v198_v42 = vsel %vm197_vm6, %v1020_v40, %v196_v38  ;;  %v199_v41 = vsel %vm197_vm6, %v196_v38, %v1020_v40  ;;  %v135_v45 = vmul.f32 %v743_v37, %v1003_v30  ;;  %v1118_v1 = vpop.permute.xlu2 %282 }
  0xaf   :  { %v202_v46 = vrot.slane %v198_v42, 7  ;;  %729 = vset.pattern.permute.xlu2 %v837_v14  ;;  %v136_v47 = vmul.f32 %v745_v33, %v1003_v30  ;;  %v231_v30 = vperm.slane %v219_v48, 1  ;;  %v747_v55 = vpop.eup %746 }
  0xb0   :  { %595 = vperm.xlu2 %729, %v934_v12   ;;  %v140_v49 = vadd.f32 %v139_v59, %v135_v45  ;;  %v749_v56 = vpop.eup %748 }
  0xb1   :  { %v204_v50 = vsel %vm203_vm1, %v199_v41, %v202_v46  ;;  %728 = vset.pattern.permute.xlu1 %v837_v14  ;;  %v149_v40 = vadd.f32 %v148_v60, %v136_v47 }
  0xb2   :  { %v206_v51 = vsel %vm38_vm8, %v204_v50, %v895_v6  ;;  %591 = vperm.xlu1 %728, %v916_v10  }
  0xb3   :  { %v223_v53 = vperm.slane %v206_v51, 0  ;;  %v224_v54 = vperm.slane %v206_v51, 1  ;;  %v236_v51 = vmul.f32 4.0, %v895_v6 }
  0xb5   :  { %v227_v57 = vadd.f32 %v223_v53, %v220_v29  ;;  %v228_v58 = vadd.f32 %v224_v54, %v221_v32  ;;  %v129_v59 = vpop.permute.xlu0 %128  ;;  %v1114_v61 = vpop.permute.xlu1 %250  ;;  %v238_v53 = vperm.slane %v236_v51, 0  ;;  %v239_v54 = vperm.slane %v236_v51, 1 }
  0xb6   :  { %v137_v63 = vmul.f32 %v747_v55, %v129_v59  ;;  %v138_v14 = vmul.f32 %v749_v56, %v129_v59  ;;  %v244_v55 = vstv %s682_s19  ;;  %v265_v6 = vmul.f32 %v1114_v61, %v997_v25 }
  0xb7   :  { %v234_v60 = vadd.f32 %v230_v52, %v227_v57  ;;  %v1116_v0 = vadd.f32 %v231_v30, %v228_v58  ;;  %v267_v58 = vmul.f32 %v1062_v5, %v997_v25 }
  0xb8   :  { %v141_v3 = vadd.f32 %v140_v49, %v137_v63  ;;  %v150_v4 = vadd.f32 %v149_v40, %v138_v14  ;;  %599 = vperm.xlu2 %729, %v947_v13   ;;  %v268_v14 = vmul.f32 %v1062_v5, %v999_v26  ;;  %v289_v5 = vadd.f32 %v1092_v39, %v265_v6 }
  0xb9   :  { %v242_v59 = vsub.f32 %v234_v60, %v238_v53 }
  0xba   :  { %v142_v8 = vrot.slane %v141_v3, 4  ;;  %v151_v19 = vrot.slane %v150_v4, 4  ;;  %730 = vset.pattern.permute.xlu1 %v835_v11  ;;  %v1129_v11 = vpop.permute.xlu2 %310 }
  0xbb   :  { %579 = vperm.xlu1 %730, %v986_v21  }
  0xbc   :  { %v143_v20 = vadd.f32 %v142_v8, %v141_v3  ;;  %v152_v22 = vadd.f32 %v151_v19, %v150_v4  ;;  %v243_v3 = vsub.f32 %v1116_v0, %v239_v54  ;;  %v266_v8 = vmul.f32 %v1114_v61, %v999_v26 }
  0xbd   :  { %v1123_v23 = vpop.permute.xlu0 %446 }
  0xbe   :  { %v144_v27 = vrot.slane %v143_v20, 2  ;;  %v153_v24 = vrot.slane %v152_v22, 2  ;;  %v1125_v28 = vpop.permute.xlu1 %262  ;;  %v290_v0 = vadd.f32 %v1092_v39, %v266_v8 }
  0xc0   :  { %v145_v29 = vadd.f32 %v144_v27, %v143_v20  ;;  %v154_v31 = vadd.f32 %v153_v24, %v152_v22  ;;  %732 = vset.pattern.permute.xlu2 %v838_v17 }
  0xc1   :  { %627 = vperm.xlu2 %732, %v934_v12  }
  0xc2   :  { %v146_v32 = vrot.slane %v145_v29, 1  ;;  %v155_v7 = vrot.slane %v154_v31, 1  ;;  %v1134_v48 = vpop.permute.xlu2 %318 }
  0xc3   :  { %731 = vset.pattern.permute.xlu1 %v838_v17 }
  0xc4   :  { %v147_v9 = vadd.f32 %v146_v32, %v145_v29  ;;  %v156_v37 = vadd.f32 %v155_v7, %v154_v31  ;;  %623 = vperm.xlu1 %731, %v916_v10  }
  0xc6   :  { %v158_v38 = vadd.f32 %v157_v34, %v147_v9  ;;  %v159_v33 = vadd.f32 %v157_v34, %v156_v37  ;;  %v259_v42 = vpop.permute.xlu0 %258  ;;  %v363_v34 = vld [vmem:[%s1281_s0] ss:$2 sm:$0x3]  ;;  %v271_v9 = vmul.f32 %v1125_v28, %v997_v25  ;;  %v272_v37 = vmul.f32 %v1125_v28, %v999_v26  ;;  %s1198_s0 = sld [smem:[#allocation2 + $0x2]] }
  0xc7   :  { %v279_v41 = vpop.permute.xlu1 %278  ;;  %v269_v19 = vmul.f32 %v259_v42, %v997_v25  ;;  %v270_v60 = vmul.f32 %v259_v42, %v999_v26  ;;  %v1174_v39 = vperm.slane %v363_v34, 0 }
  0xc8   :  { %v160_v45 = vsub.f32 0.0, %v158_v38  ;;  %v161_v46 = vsub.f32 0.0, %v159_v33  ;;  %v291_v20 = vadd.f32 %v279_v41, %v267_v58  ;;  %v292_v24 = vadd.f32 %v279_v41, %v268_v14 }
  0xc9   :  { %635 = vperm.xlu2 %732, %v986_v21   ;;  %v293_v61 = vadd.f32 %v1118_v1, %v269_v19  ;;  %v294_v7 = vadd.f32 %v1118_v1, %v270_v60  ;;  %v1176_v1 = vperm.slane %v363_v34, 1  ;;  %v397_v54 = vmul.f32 %v1042_v62, %v1174_v39 }
  0xca   :  { %v162_v12 = vmul.f32 1.442695, %v160_v45  ;;  %v164_v47 = vmul.f32 1.442695, %v161_v46  ;;  %v1142_v21 = vpop.permute.xlu2 %389 }
  0xcb   :  { %v402_v8 = vmul.f32 %v1142_v21, %v1176_v1 }
  0xcc   :  { %750 = vpow2.f32 %v162_v12  ;;  %631 = vperm.xlu1 %731, %v947_v13  }
  0xcd   :  { %752 = vpow2.f32 %v164_v47 }
  0xce   :  { %v1137_v17 = vpop.permute.xlu0 %507 }
  0xd0   :  { %v1139_v49 = vpop.permute.xlu1 %306 }
  0xd2   :  { %v751_v10 = vpop.eup %750  ;;  %v407_v31 = vpop.permute.xlu2 %406 }
  0xd3   :  { %v753_v50 = vpop.eup %752  ;;  %v166_v40 = vadd.f32 1.0, %v751_v10  ;;  %v421_v6 = vadd.f32 %v407_v31, %v397_v54 }
  0xd4   :  { %v167_v52 = vadd.f32 1.0, %v753_v50 }
  0xd5   :  { %754 = vrcp.f32 %v166_v40 }
  0xd6   :  { %756 = vrcp.f32 %v167_v52  ;;  %v1144_v30 = vpop.permute.xlu0 %525 }
  0xd7   :  { %758 = vtanh.f32 %v291_v20 }
  0xd8   :  { %v315_v13 = vpop.permute.xlu1 %314  ;;  %760 = vtanh.f32 %v292_v24 }
  0xd9   :  { %762 = vtanh.f32 %v289_v5 }
  0xda   :  { %764 = vtanh.f32 %v290_v0  ;;  %v419_v42 = vpop.permute.xlu2 %418 }
  0xdb   :  { %v755_v56 = vpop.eup %754  ;;  %766 = vtanh.f32 %v293_v61 }
  0xdc   :  { %v757_v57 = vpop.eup %756  ;;  %v245_v63 = vmul.f32 %v755_v56, %v244_v55  ;;  %768 = vtanh.f32 %v294_v7 }
  0xdd   :  { %v246_v4 = vmul.f32 %v757_v57, %v244_v55  ;;  %v759_v33 = vpop.eup %758  ;;  %v398_v57 = vmul.f32 %v1042_v62, %v1176_v1 }
  0xde   :  { %v1156_v22 = vpop.permute.xlu0 %575  ;;  %v1158_v27 = vmul.f32 %v245_v63, %v242_v59  ;;  %v761_v46 = vpop.eup %760  ;;  %v323_v28 = vmul.f32 %v759_v33, %v1129_v11 }
  0xdf   :  { %v1161_v29 = vmul.f32 %v246_v4, %v243_v3  ;;  %v763_v10 = vpop.eup %762  ;;  %v324_v51 = vmul.f32 %v761_v46, %v1129_v11  ;;  %v401_v11 = vmul.f32 %v1142_v21, %v1174_v39  ;;  %v422_v3 = vadd.f32 %v407_v31, %v398_v57 }
  0xe0   :  { %v765_v26 = vpop.eup %764  ;;  %v321_v50 = vmul.f32 %v763_v10, %v1139_v49 }
  0xe1   :  { %v385_v32 = vpop.permute.xlu1 %384  ;;  %v767_v40 = vpop.eup %766  ;;  %v322_v52 = vmul.f32 %v765_v26, %v1139_v49 }
  0xe2   :  { %v399_v12 = vmul.f32 %v385_v32, %v1174_v39  ;;  %v400_v25 = vmul.f32 %v385_v32, %v1176_v1  ;;  %v769_v53 = vpop.eup %768  ;;  %v325_v55 = vmul.f32 %v767_v40, %v315_v13  ;;  %v329_v63 = vadd.f32 %v323_v28, %v321_v50 }
  0xe3   :  { %v326_v58 = vmul.f32 %v769_v53, %v315_v13  ;;  %v338_v49 = vadd.f32 %v324_v51, %v322_v52  ;;  %v443_v13 = vpop.permute.xlu2 %442 }
  0xe4   :  { %v423_v56 = vadd.f32 %v1089_v36, %v399_v12  ;;  %v424_v59 = vadd.f32 %v1089_v36, %v400_v25  ;;  %v330_v19 = vadd.f32 %v329_v63, %v325_v55  ;;  %v347_v63 = vstv %s1198_s0 }
  0xe5   :  { %v339_v62 = vadd.f32 %v338_v49, %v326_v58 }
  0xe7   :  { %v287_v38 = vpop.permute.xlu0 %286 }
  0xe8   :  { %v295_v41 = vadd.f32 %v287_v38, %v271_v9  ;;  %v296_v45 = vadd.f32 %v287_v38, %v272_v37 }
  0xe9   :  { %v395_v47 = vpop.permute.xlu1 %394 }
  0xea   :  { %770 = vtanh.f32 %v295_v41  ;;  %v403_v32 = vmul.f32 %v395_v47, %v1174_v39  ;;  %v404_v21 = vmul.f32 %v395_v47, %v1176_v1 }
  0xeb   :  { %772 = vtanh.f32 %v296_v45  ;;  %v1200_v51 = vpop.permute.xlu2 %497 }
  0xec   :  { %774 = vtanh.f32 %v423_v56  ;;  %v427_v38 = vadd.f32 %v419_v42, %v403_v32  ;;  %v428_v45 = vadd.f32 %v419_v42, %v404_v21 }
  0xed   :  { %776 = vtanh.f32 %v424_v59 }
  0xee   :  { %778 = vtanh.f32 %v421_v6 }
  0xef   :  { %780 = vtanh.f32 %v422_v3  ;;  %v1204_v59 = vpop.permute.xlu0 %603 }
  0xf0   :  { %v771_v14 = vpop.eup %770 }
  0xf1   :  { %v773_v4 = vpop.eup %772  ;;  %v327_v20 = vmul.f32 %v771_v14, %v1134_v48 }
  0xf2   :  { %v328_v36 = vmul.f32 %v773_v4, %v1134_v48  ;;  %v415_v60 = vpop.permute.xlu1 %414  ;;  %v775_v34 = vpop.eup %774 }
  0xf3   :  { %v331_v24 = vadd.f32 %v330_v19, %v327_v20  ;;  %v425_v5 = vadd.f32 %v415_v60, %v401_v11  ;;  %v426_v0 = vadd.f32 %v415_v60, %v402_v8  ;;  %v777_v48 = vpop.eup %776  ;;  %v455_v25 = vmul.f32 %v775_v34, %v443_v13 }
  0xf4   :  { %v340_v31 = vadd.f32 %v339_v62, %v328_v36  ;;  %v779_v33 = vpop.eup %778  ;;  %v456_v26 = vmul.f32 %v777_v48, %v443_v13 }
  0xf5   :  { %v332_v61 = vrot.slane %v331_v24, 4  ;;  %782 = vtanh.f32 %v425_v5  ;;  %v781_v46 = vpop.eup %780  ;;  %v506_v5 = vpop.permute.xlu2 %505 }
  0xf6   :  { %v341_v7 = vrot.slane %v340_v31, 4  ;;  %784 = vtanh.f32 %v426_v0 }
  0xf7   :  { %v333_v9 = vadd.f32 %v332_v61, %v331_v24  ;;  %786 = vtanh.f32 %v427_v38  ;;  %v528_v21 = vpop.permute.xlu0 %527 }
  0xf8   :  { %v342_v37 = vadd.f32 %v341_v7, %v340_v31  ;;  %788 = vtanh.f32 %v428_v45 }
  0xf9   :  { %v334_v41 = vrot.slane %v333_v9, 2 }
  0xfa   :  { %v343_v12 = vrot.slane %v342_v37, 2 }
  0xfb   :  { %v783_v10 = vpop.eup %782  ;;  %v335_v28 = vadd.f32 %v334_v41, %v333_v9  ;;  %v439_v47 = vpop.permute.xlu1 %438  ;;  %v530_v9 = vsel %vm211_vm0, %v528_v21, %v1144_v30 }
  0xfc   :  { %v785_v50 = vpop.eup %784  ;;  %v344_v40 = vadd.f32 %v343_v12, %v342_v37  ;;  %v453_v52 = vmul.f32 %v779_v33, %v439_v47  ;;  %v454_v53 = vmul.f32 %v781_v46, %v439_v47  ;;  %v457_v55 = vmul.f32 %v783_v10, %v1123_v23 }
  0xfd   :  { %v336_v54 = vrot.slane %v335_v28, 1  ;;  %v458_v58 = vmul.f32 %v785_v50, %v1123_v23  ;;  %v787_v3 = vpop.eup %786  ;;  %v533_v12 = vrot.slane %v530_v9, 7  ;;  %v529_v10 = vsel %vm211_vm0, %v1144_v30, %v528_v21 }
  0xfe   :  { %v345_v42 = vrot.slane %v344_v40, 1  ;;  %v461_v56 = vadd.f32 %v455_v25, %v453_v52  ;;  %v470_v57 = vadd.f32 %v456_v26, %v454_v53  ;;  %v789_v19 = vpop.eup %788  ;;  %v516_v25 = vpop.permute.xlu2 %515  ;;  %v479_v47 = vstv %s689_s22 }
  0xff   :  { %v337_v6 = vadd.f32 %v336_v54, %v335_v28  ;;  %v510_v50 = vsel %vm188_vm4, %v1137_v17, %v506_v5  ;;  %v556_v21 = vperm.slane %v553_v35, 1 }
 0x100   :  { %v346_v14 = vadd.f32 %v345_v42, %v344_v40  ;;  %v462_v11 = vadd.f32 %v461_v56, %v457_v55  ;;  %v471_v49 = vadd.f32 %v470_v57, %v458_v58  ;;  %v512_v30 = vsel %vm37_vm5, %v510_v50, %v963_v16 }
 0x101   :  { %v348_v4 = vadd.f32 %v347_v63, %v337_v6  ;;  %v587_v50 = vmul.f32 %v1156_v22, %v1176_v1 }
 0x102   :  { %v349_v8 = vadd.f32 %v347_v63, %v346_v14 }
 0x103   :  { %v451_v20 = vpop.permute.xlu1 %450  ;;  %v350_v23 = vadd.f32 %v348_v4, %v1158_v27  ;;  %v509_v27 = vsel %vm188_vm4, %v506_v5, %v1137_v17 }
 0x104   :  { %v351_v62 = vadd.f32 %v349_v8, %v1161_v29  ;;  %v459_v13 = vmul.f32 %v787_v3, %v451_v20  ;;  %v460_v36 = vmul.f32 %v789_v19, %v451_v20 }
 0x106   :  { %v354_v24 = vrot.slane %v351_v62, 7  ;;  %v463_v0 = vadd.f32 %v462_v11, %v459_v13  ;;  %v472_v31 = vadd.f32 %v471_v49, %v460_v36  ;;  %v572_v20 = vpop.permute.xlu2 %571 }
 0x108   :  { %v464_v32 = vrot.slane %v463_v0, 4  ;;  %v473_v61 = vrot.slane %v472_v31, 4  ;;  %v355_v7 = vsel %vm203_vm1, %v350_v23, %v354_v24 }
 0x109   :  { %361 = vst.msk [vmem:[%s1285_s4] ss:$2 sm:$0x3] %vm1209_vm9, %v355_v7  ;;  %v561_v7 = vstv %s690_s24 }
 0x10a   :  { %v465_v43 = vadd.f32 %v464_v32, %v463_v0  ;;  %v474_v29 = vadd.f32 %v473_v61, %v472_v31  ;;  %v555_v61 = vperm.slane %v553_v35, 0 }
 0x10b   :  { %v500_v34 = vpop.permute.xlu1 %499 }
 0x10c   :  { %v466_v48 = vrot.slane %v465_v43, 2  ;;  %v475_v37 = vrot.slane %v474_v29, 2  ;;  %v502_v38 = vsel %vm179_vm2, %v500_v34, %v1200_v51  ;;  %v501_v63 = vsel %vm179_vm2, %v1200_v51, %v500_v34 }
 0x10d   :  { %v503_v33 = vsel %vm34_vm3, %v502_v38, %v971_v18  ;;  %v534_v18 = vsel %vm203_vm1, %v529_v10, %v533_v12  ;;  %v538_v3 = vadd.f32 %v512_v30, %v501_v63  ;;  %v585_v34 = vmul.f32 %v572_v20, %v1176_v1 }
 0x10e   :  { %v467_v41 = vadd.f32 %v466_v48, %v465_v43  ;;  %v476_v45 = vadd.f32 %v475_v37, %v474_v29  ;;  %v537_v46 = vadd.f32 %v509_v27, %v503_v33  ;;  %v536_v57 = vsel %vm39_vm7, %v534_v18, %v960_v15  ;;  %v596_v31 = vpop.permute.xlu2 %595 }
 0x10f   :  { %v547_v2 = vperm.slane %v536_v57, 0  ;;  %v548_v19 = vperm.slane %v536_v57, 1  ;;  %v584_v29 = vmul.f32 %v572_v20, %v1174_v39  ;;  %v609_v12 = vadd.f32 %v596_v31, %v585_v34 }
 0x110   :  { %v468_v26 = vrot.slane %v467_v41, 1  ;;  %v477_v28 = vrot.slane %v476_v45, 1 }
 0x112   :  { %v469_v40 = vadd.f32 %v468_v26, %v467_v41  ;;  %v478_v52 = vadd.f32 %v477_v28, %v476_v45  ;;  %v586_v26 = vmul.f32 %v1156_v22, %v1174_v39 }
 0x113   :  { %v514_v53 = vpop.permute.xlu1 %513 }
 0x114   :  { %v480_v54 = vadd.f32 %v479_v47, %v469_v40  ;;  %v481_v55 = vadd.f32 %v479_v47, %v478_v52  ;;  %v517_v42 = vsel %vm197_vm6, %v514_v53, %v516_v25  ;;  %v518_v6 = vsel %vm197_vm6, %v516_v25, %v514_v53 }
 0x115   :  { %v521_v56 = vrot.slane %v517_v42, 7 }
 0x116   :  { %v482_v17 = vsub.f32 0.0, %v480_v54  ;;  %v483_v58 = vsub.f32 0.0, %v481_v55  ;;  %v600_v10 = vpop.permute.xlu2 %599 }
 0x117   :  { %v522_v14 = vsel %vm203_vm1, %v518_v6, %v521_v56  ;;  %v610_v18 = vadd.f32 %v600_v10, %v586_v26  ;;  %v611_v53 = vadd.f32 %v600_v10, %v587_v50 }
 0x118   :  { %v484_v11 = vmul.f32 1.442695, %v482_v17  ;;  %v486_v49 = vmul.f32 1.442695, %v483_v58  ;;  %v524_v16 = vsel %vm38_vm8, %v522_v14, %v960_v15  ;;  %v608_v15 = vadd.f32 %v596_v31, %v584_v29 }
 0x119   :  { %v540_v4 = vperm.slane %v524_v16, 0  ;;  %v541_v8 = vperm.slane %v524_v16, 1 }
 0x11a   :  { %790 = vpow2.f32 %v484_v11 }
 0x11b   :  { %792 = vpow2.f32 %v486_v49  ;;  %v544_v51 = vadd.f32 %v540_v4, %v537_v46  ;;  %v545_v62 = vadd.f32 %v541_v8, %v538_v3  ;;  %v568_v44 = vpop.permute.xlu1 %567 }
 0x11c   :  { %v582_v45 = vmul.f32 %v568_v44, %v1174_v39  ;;  %v583_v25 = vmul.f32 %v568_v44, %v1176_v1 }
 0x11d   :  { %v551_v13 = vadd.f32 %v547_v2, %v544_v51  ;;  %v552_v36 = vadd.f32 %v548_v19, %v545_v62 }
 0x11e   :  { %v628_v42 = vpop.permute.xlu2 %627 }
 0x11f   :  { %v559_v9 = vsub.f32 %v551_v13, %v555_v61  ;;  %v560_v37 = vsub.f32 %v552_v36, %v556_v21 }
 0x120   :  { %v791_v23 = vpop.eup %790 }
 0x121   :  { %v793_v24 = vpop.eup %792  ;;  %v488_v5 = vadd.f32 1.0, %v791_v23 }
 0x122   :  { %v489_v0 = vadd.f32 1.0, %v793_v24 }
 0x123   :  { %794 = vrcp.f32 %v488_v5 }
 0x124   :  { %796 = vrcp.f32 %v489_v0  ;;  %v592_v32 = vpop.permute.xlu1 %591 }
 0x125   :  { %v606_v28 = vadd.f32 %v592_v32, %v582_v45  ;;  %v607_v40 = vadd.f32 %v592_v32, %v583_v25  ;;  %798 = vtanh.f32 %v608_v15 }
 0x126   :  { %800 = vtanh.f32 %v609_v12  ;;  %v636_v16 = vpop.permute.xlu2 %635 }
 0x127   :  { %802 = vtanh.f32 %v606_v28 }
 0x128   :  { %804 = vtanh.f32 %v607_v40 }
 0x129   :  { %v795_v43 = vpop.eup %794  ;;  %806 = vtanh.f32 %v610_v18 }
 0x12a   :  { %v797_v27 = vpop.eup %796  ;;  %v562_v48 = vmul.f32 %v795_v43, %v561_v7  ;;  %808 = vtanh.f32 %v611_v53 }
 0x12b   :  { %v563_v38 = vmul.f32 %v797_v27, %v561_v7  ;;  %v799_v30 = vpop.eup %798  ;;  %v664_v7 = vstv %s691_s25 }
 0x12c   :  { %v1259_v33 = vmul.f32 %v562_v48, %v559_v9  ;;  %v801_v22 = vpop.eup %800  ;;  %v640_v14 = vmul.f32 %v799_v30, %v628_v42 }
 0x12d   :  { %v1261_v41 = vmul.f32 %v563_v38, %v560_v37  ;;  %v580_v46 = vpop.permute.xlu1 %579  ;;  %v803_v56 = vpop.eup %802  ;;  %v641_v11 = vmul.f32 %v801_v22, %v628_v42 }
 0x12e   :  { %v588_v47 = vmul.f32 %v580_v46, %v1174_v39  ;;  %v589_v52 = vmul.f32 %v580_v46, %v1176_v1  ;;  %v805_v1 = vpop.eup %804 }
 0x12f   :  { %v807_v57 = vpop.eup %806 }
 0x130   :  { %v612_v54 = vadd.f32 %v1204_v59, %v588_v47  ;;  %v613_v55 = vadd.f32 %v1204_v59, %v589_v52  ;;  %v809_v63 = vpop.eup %808 }
 0x132   :  { %810 = vtanh.f32 %v612_v54 }
 0x133   :  { %812 = vtanh.f32 %v613_v55 }
 0x136   :  { %v624_v39 = vpop.permute.xlu1 %623 }
 0x137   :  { %v638_v17 = vmul.f32 %v803_v56, %v624_v39  ;;  %v639_v58 = vmul.f32 %v805_v1, %v624_v39 }
 0x138   :  { %v811_v6 = vpop.eup %810 }
 0x139   :  { %v813_v49 = vpop.eup %812  ;;  %v646_v2 = vadd.f32 %v640_v14, %v638_v17  ;;  %v655_v3 = vadd.f32 %v641_v11, %v639_v58  ;;  %v644_v19 = vmul.f32 %v811_v6, %v636_v16 }
 0x13a   :  { %v645_v20 = vmul.f32 %v813_v49, %v636_v16 }
 0x13e   :  { %v632_v59 = vpop.permute.xlu1 %631 }
 0x13f   :  { %v642_v4 = vmul.f32 %v807_v57, %v632_v59  ;;  %v643_v8 = vmul.f32 %v809_v63, %v632_v59 }
 0x141   :  { %v647_v51 = vadd.f32 %v646_v2, %v642_v4  ;;  %v656_v62 = vadd.f32 %v655_v3, %v643_v8 }
 0x143   :  { %v648_v44 = vadd.f32 %v647_v51, %v644_v19  ;;  %v657_v13 = vadd.f32 %v656_v62, %v645_v20 }
 0x145   :  { %v649_v36 = vrot.slane %v648_v44, 4  ;;  %v658_v23 = vrot.slane %v657_v13, 4 }
 0x147   :  { %v650_v24 = vadd.f32 %v649_v36, %v648_v44  ;;  %v659_v5 = vadd.f32 %v658_v23, %v657_v13 }
 0x149   :  { %v651_v0 = vrot.slane %v650_v24, 2  ;;  %v660_v35 = vrot.slane %v659_v5, 2 }
 0x14b   :  { %v652_v31 = vadd.f32 %v651_v0, %v650_v24  ;;  %v661_v32 = vadd.f32 %v660_v35, %v659_v5 }
 0x14d   :  { %v653_v61 = vrot.slane %v652_v31, 1  ;;  %v662_v21 = vrot.slane %v661_v32, 1 }
 0x14f   :  { %v654_v43 = vadd.f32 %v653_v61, %v652_v31  ;;  %v663_v29 = vadd.f32 %v662_v21, %v661_v32 }
 0x151   :  { %v665_v27 = vadd.f32 %v664_v7, %v654_v43  ;;  %v666_v34 = vadd.f32 %v664_v7, %v663_v29 }
 0x153   :  { %v667_v9 = vadd.f32 %v665_v27, %v1259_v33  ;;  %v668_v48 = vadd.f32 %v666_v34, %v1261_v41 }
 0x155   :  { %v671_v37 = vrot.slane %v668_v48, 7 }
 0x157   :  { %v672_v38 = vsel %vm203_vm1, %v667_v9, %v671_v37 }
 0x158   :  { %692 = vst.msk [vmem:[%s1285_s4 + $0x1] ss:$2 sm:$0x3] %vm1209_vm9, %v672_v38 }
 0x159   :  { %680 = vsyncpa [#allocation3], 1 }

</bundles_post_ra>
